<compile_context>
chip_gen: v7x
topology: tpu7x:2x2x1
jax: 0.10.0
libtpu: 0.0.40
codegen_flags: <defaults>
</compile_context>

<pallas_src>
import functools

import jax
import jax.numpy as jnp
from jax.experimental import pallas as pl
from jax.experimental.pallas import tpu as pltpu


_LANE = 128
_MAX_SPATIAL_TILE = 2048          # lanes per spatial tile; double-buffers on all gens

# Columns of the packed per-channel parameter array (OUTC, 6).
_DR_SCALE, _DR_SHIFT, _DR_PRELU, _MA_SCALE, _MA_SHIFT, _MA_PRELU = range(6)


def _merge_kernel(ctx_ref,      # (1, C_CTX, T)   context tile, channels-first
                  hr_ref,       # (1, CH_HR, T)   highres tile
                  w_dr_ref,     # (OUTC, C_CTX)   dim_reduction conv weight (bf16)
                  w_ma_a_ref,   # (OUTC, OUTC)    merge_att weight, context rows (bf16)
                  w_ma_b_ref,   # (OUTC, CH_HR)   merge_att weight, highres rows (bf16)
                  pp_ref,       # (OUTC, 6)       packed BN scale/shift + PReLU slopes (f32)
                  ctx_out_ref,  # (1, OUTC, T)    dim-reduced context (module output #1)
                  m_ref,        # (1, OUTC, T)    merge_att(merge), pre-SE scaling
                  xsum_ref,     # (1, 1, OUTC, 1) per-tile sum of dim-reduced context
                  hrsum_ref,    # (1, 1, CH_HR, 1) per-tile sum of highres
                  *, hw_total, tile):
    cd = w_dr_ref.dtype                       # MXU compute dtype (bf16)
    pp = pp_ref[...]                          # (OUTC, 6) f32

    def col(i):                               # (OUTC, 1), broadcasts across lanes
        return pp[:, i:i + 1]

    ctx = ctx_ref[0].astype(cd)               # (C_CTX, T)
    hr_f32 = hr_ref[0].astype(jnp.float32)    # (CH_HR, T)

    # ---- dim_reduction: 1x1 conv + fused (eval) BN + PReLU -----------------
    x = jnp.dot(w_dr_ref[...], ctx, preferred_element_type=jnp.float32)  # (OUTC, T)
    x = x * col(_DR_SCALE) + col(_DR_SHIFT)
    x = jnp.where(x >= 0, x, x * col(_DR_PRELU))
    ctx_out_ref[0] = x.astype(ctx_out_ref.dtype)

    # ---- merge_att on merge = concat(x, hr): weight split at concat boundary
    m = (jnp.dot(w_ma_a_ref[...], x.astype(cd), preferred_element_type=jnp.float32)
         + jnp.dot(w_ma_b_ref[...], hr_ref[0].astype(cd),
                   preferred_element_type=jnp.float32))
    m = m * col(_MA_SCALE) + col(_MA_SHIFT)
    m = jnp.where(m >= 0, m, m * col(_MA_PRELU))
    # TODO(synk): m could be stored as bf16 to halve intermediate traffic if
    # downstream tolerates the extra rounding; kept f32 for exact-ish parity.
    m_ref[0] = m.astype(m_ref.dtype)

    # ---- partial sums for the SE global average pool (mask the padded tail)
    t = pl.program_id(1)
    valid = hw_total - t * tile               # == tile except possibly last tile
    lane = jax.lax.broadcasted_iota(jnp.int32, (1, tile), 1)
    msk = lane < valid
    xsum_ref[0, 0] = jnp.sum(jnp.where(msk, x, 0.0), axis=1, keepdims=True)
    hrsum_ref[0, 0] = jnp.sum(jnp.where(msk, hr_f32, 0.0), axis=1, keepdims=True)


def _scale_kernel(m_ref,    # (1, OUTC, T)
                  s_ref,    # (1, OUTC, 1)  per-batch sigmoid SE gate
                  co_ref):  # (1, OUTC, T)
    co_ref[0] = (m_ref[0] * s_ref[0]).astype(co_ref.dtype)


def _bn_fuse(gamma, beta, running_mean, running_var, eps=1e-5):
    scale = gamma / jnp.sqrt(running_var + eps)
    return scale, beta - running_mean * scale


def init_params(key, c_ctx, inc, outc, compute_dtype=jnp.bfloat16):
    """Deterministic params mirroring the module's (eval-mode) parameters.

    Conv weights are kept in PyTorch (out, in) orientation (1x1 kernels
    squeezed), which is exactly what the channels-first kernel wants.
    """
    ks = jax.random.split(key, 6)
    w_dr = jax.random.normal(ks[0], (outc, c_ctx), jnp.float32) * (1.0 / c_ctx) ** 0.5
    w_ma = jax.random.normal(ks[1], (outc, inc), jnp.float32) * (1.0 / inc) ** 0.5
    w_se1 = jax.random.normal(ks[2], (outc, inc), jnp.float32) * (1.0 / inc) ** 0.5
    w_se2 = jax.random.normal(ks[3], (outc, outc), jnp.float32) * (1.0 / outc) ** 0.5

    ones = jnp.ones((outc,), jnp.float32)
    zeros = jnp.zeros((outc,), jnp.float32)
    dr_scale, dr_shift = _bn_fuse(ones, zeros, zeros, ones)   # fresh BN stats
    ma_scale, ma_shift = _bn_fuse(ones, zeros, zeros, ones)
    se_scale, se_shift = _bn_fuse(ones, zeros, zeros, ones)
    prelu = jnp.full((outc,), 0.25, jnp.float32)              # nn.PReLU(outc) init

    return {
        # MXU weights (bf16), channels-first orientation.
        "w_dr": w_dr.astype(compute_dtype),
        "w_ma_a": w_ma[:, :outc].astype(compute_dtype),
        "w_ma_b": w_ma[:, outc:].astype(compute_dtype),
        # Packed per-channel BN/PReLU vectors (f32 epilogue).
        "pp": jnp.stack([dr_scale, dr_shift, prelu, ma_scale, ma_shift, prelu], axis=1),
        # channel_se parameters (tiny SE MLP, evaluated in plain JAX, f32).
        "w_se1_a": w_se1[:, :outc], "w_se1_b": w_se1[:, outc:],
        "b_se1": jax.random.normal(ks[4], (outc,), jnp.float32) * 0.01,
        "se_prelu": prelu,
        "w_se2": w_se2,
        "b_se2": jax.random.normal(ks[5], (outc,), jnp.float32) * 0.01,
        "se_scale": se_scale, "se_shift": se_shift,
    }


@jax.jit
def merge_attention(context_nchw, highres_nchw, params):
    """context_nchw: (B, 128, H, W); highres_nchw: (B, inc-outc, H, W).

    Returns (context, co) in NCHW, matching MergeAttention.forward (eval mode).
    """
    B, c_ctx, H, W = context_nchw.shape
    ch_hr = highres_nchw.shape[1]
    outc = params["w_dr"].shape[0]
    HW = H * W

    # NCHW -> (B, C, HW): pure reshape, no data movement.
    ctx = context_nchw.reshape(B, c_ctx, HW)
    hr = highres_nchw.reshape(B, ch_hr, HW)

    # Spatial tiling: lane-dense tiles (multiple of 128); ragged tail is
    # zero-padded and masked out of the SE partial sums inside the kernel.
    if HW <= _MAX_SPATIAL_TILE:
        tile = max(_LANE, ((HW + _LANE - 1) // _LANE) * _LANE)
    else:
        tile = _MAX_SPATIAL_TILE
    hw_pad = ((HW + tile - 1) // tile) * tile
    n_tiles = hw_pad // tile
    if hw_pad != HW:
        pad = ((0, 0), (0, 0), (0, hw_pad - HW))
        ctx = jnp.pad(ctx, pad)
        hr = jnp.pad(hr, pad)

    # Explicit VMEM budget from the chosen tiles (double-buffered), clamped so
    # it is safe on every generation (v5e default 16 MiB, v7x physical 64 MiB).
    in_bytes = tile * (c_ctx * ctx.dtype.itemsize + ch_hr * hr.dtype.itemsize)
    out_bytes = tile * 2 * outc * 4
    vmem_limit = int(min(max(4 * (in_bytes + out_bytes), 16 * 1024 * 1024),
                         32 * 1024 * 1024))

    def w_spec(a):                       # small weights: whole array per step
        return pl.BlockSpec(a.shape, lambda b, t: (0, 0))

    def tile3(c):                        # (B, C, HW_pad) tiled over batch+spatial
        return pl.BlockSpec((1, c, tile), lambda b, t: (b, 0, t))

    def sum4(c):                         # per-(batch, tile) partial sums
        return pl.BlockSpec((1, 1, c, 1), lambda b, t: (b, t, 0, 0))

    kern = functools.partial(_merge_kernel, hw_total=HW, tile=tile)
    ctx_out, m, xsum, hrsum = pl.pallas_call(
        kern,
        out_shape=(
            jax.ShapeDtypeStruct((B, outc, hw_pad), jnp.float32),       # context
            jax.ShapeDtypeStruct((B, outc, hw_pad), jnp.float32),       # merge_att(merge)
            jax.ShapeDtypeStruct((B, n_tiles, outc, 1), jnp.float32),   # sum of context part
            jax.ShapeDtypeStruct((B, n_tiles, ch_hr, 1), jnp.float32),  # sum of highres part
        ),
        grid_spec=pltpu.PrefetchScalarGridSpec(
            num_scalar_prefetch=0,
            grid=(B, n_tiles),
            in_specs=[tile3(c_ctx), tile3(ch_hr),
                      w_spec(params["w_dr"]), w_spec(params["w_ma_a"]),
                      w_spec(params["w_ma_b"]), w_spec(params["pp"])],
            out_specs=[tile3(outc), tile3(outc), sum4(outc), sum4(ch_hr)],
        ),
        compiler_params=pltpu.CompilerParams(
            dimension_semantics=("parallel", "parallel"),
            vmem_limit_bytes=vmem_limit),
    )(ctx, hr, params["w_dr"], params["w_ma_a"], params["w_ma_b"], params["pp"])

    # ---- channel_se on the global average pool of merge (tiny, plain JAX) --
    # mean(concat(x, hr)) == concat(mean(x), mean(hr)); weights split to match.
    inv_hw = 1.0 / float(HW)
    x_avg = xsum[..., 0].sum(axis=1) * inv_hw        # (B, outc)
    hr_avg = hrsum[..., 0].sum(axis=1) * inv_hw      # (B, ch_hr)
    s = x_avg @ params["w_se1_a"].T + hr_avg @ params["w_se1_b"].T + params["b_se1"]
    s = jnp.where(s >= 0, s, s * params["se_prelu"])
    s = s @ params["w_se2"].T + params["b_se2"]
    s = s * params["se_scale"] + params["se_shift"]
    s = jax.nn.sigmoid(s)[..., None]                 # (B, outc, 1)

    # ---- co = merge_att(merge) * channel_se(avgpool(merge)) ----------------
    co = pl.pallas_call(
        _scale_kernel,
        out_shape=jax.ShapeDtypeStruct((B, outc, hw_pad), jnp.float32),
        grid_spec=pltpu.PrefetchScalarGridSpec(
            num_scalar_prefetch=0,
            grid=(B, n_tiles),
            in_specs=[tile3(outc),
                      pl.BlockSpec((1, outc, 1), lambda b, t: (b, 0, 0))],
            out_specs=tile3(outc),
        ),
        compiler_params=pltpu.CompilerParams(
            dimension_semantics=("parallel", "parallel"),
            vmem_limit_bytes=vmem_limit),
    )(m, s)

    # (B, C, HW_pad) -> NCHW; slicing is a no-op when HW is already lane-aligned.
    ctx_out = ctx_out[:, :, :HW].reshape(B, outc, H, W)
    co = co[:, :, :HW].reshape(B, outc, H, W)
    return ctx_out, co


if __name__ == "__main__":
    # Channel sizes exactly as used inside mynet: MergeAttention(inc=64, outc=32),
    # context has 128 channels (dim_reduction is hard-wired to 128 in), highres
    # has inc - outc = 32 channels.  Small spatial extent for the demo.
    B, H, W = 2, 16, 16
    C_CTX, OUTC, CH_HR = 128, 32, 32
    INC = OUTC + CH_HR

    key = jax.random.PRNGKey(0)
    k_ctx, k_hr, k_par = jax.random.split(key, 3)
    context = jax.random.normal(k_ctx, (B, C_CTX, H, W), jnp.float32)
    highres = jax.random.normal(k_hr, (B, CH_HR, H, W), jnp.float32)
    params = init_params(k_par, C_CTX, INC, OUTC)

    ctx_out, co = merge_attention(context, highres, params)
    jax.block_until_ready((ctx_out, co))

    assert ctx_out.shape == (B, OUTC, H, W)
    assert co.shape == (B, OUTC, H, W)
    print("KERNEL_OK")
</pallas_src>

<mosaic_0001>
module attributes {stable_mosaic.version = 11 : i64} {
  func.func @_merge_kernel(%arg0: i32, %arg1: i32, %arg2: memref<1x128x256xf32, #tpu.memory_space<vmem>>, %arg3: memref<1x32x256xf32, #tpu.memory_space<vmem>>, %arg4: memref<32x128xbf16, #tpu.memory_space<vmem>>, %arg5: memref<32x32xbf16, #tpu.memory_space<vmem>>, %arg6: memref<32x32xbf16, #tpu.memory_space<vmem>>, %arg7: memref<32x6xf32, #tpu.memory_space<vmem>>, %arg8: memref<1x32x256xf32, #tpu.memory_space<vmem>>, %arg9: memref<1x32x256xf32, #tpu.memory_space<vmem>>, %arg10: memref<1x1x32x1xf32, #tpu.memory_space<vmem>>, %arg11: memref<1x1x32x1xf32, #tpu.memory_space<vmem>>) attributes {dimension_semantics = [#tpu.dimension_semantics<parallel>, #tpu.dimension_semantics<parallel>], iteration_bounds = array<i64: 2, 1>, scalar_prefetch = 0 : i64, scratch_operands = 0 : i64, tpu.core_type = #tpu.core_type<tc>, window_params = [{transform_indices = @transform_0, window_bounds = array<i64: 1, 128, 256>}, {transform_indices = @transform_1, window_bounds = array<i64: 1, 32, 256>}, {pipeline_mode = #tpu.pipeline_mode<synchronous>, transform_indices = @transform_2, window_bounds = array<i64: 32, 128>}, {pipeline_mode = #tpu.pipeline_mode<synchronous>, transform_indices = @transform_3, window_bounds = array<i64: 32, 32>}, {pipeline_mode = #tpu.pipeline_mode<synchronous>, transform_indices = @transform_4, window_bounds = array<i64: 32, 32>}, {pipeline_mode = #tpu.pipeline_mode<synchronous>, transform_indices = @transform_5, window_bounds = array<i64: 32, 6>}, {transform_indices = @transform_6, window_bounds = array<i64: 1, 32, 256>}, {transform_indices = @transform_7, window_bounds = array<i64: 1, 32, 256>}, {transform_indices = @transform_8, window_bounds = array<i64: 1, 1, 32, 1>}, {transform_indices = @transform_9, window_bounds = array<i64: 1, 1, 32, 1>}]} {
    %c0 = arith.constant 0 : index
    %c0_0 = arith.constant 0 : index
    %0 = vector.load %arg7[%c0, %c0_0] : memref<32x6xf32, #tpu.memory_space<vmem>>, vector<32x6xf32>
    %c0_1 = arith.constant 0 : index
    %c0_2 = arith.constant 0 : index
    %c0_3 = arith.constant 0 : index
    %1 = vector.load %arg2[%c0_1, %c0_2, %c0_3] : memref<1x128x256xf32, #tpu.memory_space<vmem>>, vector<1x128x256xf32>
    %2 = vector.shape_cast %1 : vector<1x128x256xf32> to vector<128x256xf32>
    %3 = arith.truncf %2 : vector<128x256xf32> to vector<128x256xbf16>
    %c0_4 = arith.constant 0 : index
    %c0_5 = arith.constant 0 : index
    %c0_6 = arith.constant 0 : index
    %4 = vector.load %arg3[%c0_4, %c0_5, %c0_6] : memref<1x32x256xf32, #tpu.memory_space<vmem>>, vector<1x32x256xf32>
    %5 = vector.shape_cast %4 : vector<1x32x256xf32> to vector<32x256xf32>
    %c0_7 = arith.constant 0 : index
    %c0_8 = arith.constant 0 : index
    %6 = vector.load %arg4[%c0_7, %c0_8] : memref<32x128xbf16, #tpu.memory_space<vmem>>, vector<32x128xbf16>
    %cst = arith.constant dense<0.000000e+00> : vector<32x256xf32>
    %7 = tpu.matmul %6, %3, %cst {dimension_numbers = #tpu.dot_dimension_numbers<[1], [0], [0], [1], [0, 0, 1, 1], [], []>} : vector<32x128xbf16>, vector<128x256xbf16>, vector<32x256xf32> -> vector<32x256xf32>
    %8 = vector.extract_strided_slice %0 {offsets = [0, 0], sizes = [32, 1], strides = [1, 1]} : vector<32x6xf32> to vector<32x1xf32>
    %9 = vector.broadcast %8 : vector<32x1xf32> to vector<32x256xf32>
    %10 = arith.mulf %7, %9 : vector<32x256xf32>
    %11 = vector.extract_strided_slice %0 {offsets = [0, 1], sizes = [32, 1], strides = [1, 1]} : vector<32x6xf32> to vector<32x1xf32>
    %12 = vector.broadcast %11 : vector<32x1xf32> to vector<32x256xf32>
    %13 = arith.addf %10, %12 : vector<32x256xf32>
    %cst_9 = arith.constant 0.000000e+00 : f32
    %14 = vector.broadcast %cst_9 : f32 to vector<32x256xf32>
    %15 = arith.cmpf oge, %13, %14 : vector<32x256xf32>
    %16 = vector.extract_strided_slice %0 {offsets = [0, 2], sizes = [32, 1], strides = [1, 1]} : vector<32x6xf32> to vector<32x1xf32>
    %17 = vector.broadcast %16 : vector<32x1xf32> to vector<32x256xf32>
    %18 = arith.mulf %13, %17 : vector<32x256xf32>
    %19 = arith.select %15, %13, %18 : vector<32x256xi1>, vector<32x256xf32>
    %c0_10 = arith.constant 0 : index
    %c0_11 = arith.constant 0 : index
    %c0_12 = arith.constant 0 : index
    %20 = vector.load %arg8[%c0_10, %c0_11, %c0_12] : memref<1x32x256xf32, #tpu.memory_space<vmem>>, vector<1x32x256xf32>
    %21 = vector.shape_cast %20 : vector<1x32x256xf32> to vector<32x256xf32>
    %22 = vector.shape_cast %19 : vector<32x256xf32> to vector<1x32x256xf32>
    tpu.vector_store %arg8[%c0_10, %c0_11, %c0_12], %22 {strides = array<i32>} : memref<1x32x256xf32, #tpu.memory_space<vmem>>, vector<1x32x256xf32>,
    %c0_13 = arith.constant 0 : index
    %c0_14 = arith.constant 0 : index
    %23 = vector.load %arg5[%c0_13, %c0_14] : memref<32x32xbf16, #tpu.memory_space<vmem>>, vector<32x32xbf16>
    %24 = arith.truncf %19 : vector<32x256xf32> to vector<32x256xbf16>
    %cst_15 = arith.constant dense<0.000000e+00> : vector<32x256xf32>
    %25 = tpu.matmul %23, %24, %cst_15 {dimension_numbers = #tpu.dot_dimension_numbers<[1], [0], [0], [1], [0, 0, 1, 1], [], []>} : vector<32x32xbf16>, vector<32x256xbf16>, vector<32x256xf32> -> vector<32x256xf32>
    %c0_16 = arith.constant 0 : index
    %c0_17 = arith.constant 0 : index
    %26 = vector.load %arg6[%c0_16, %c0_17] : memref<32x32xbf16, #tpu.memory_space<vmem>>, vector<32x32xbf16>
    %c0_18 = arith.constant 0 : index
    %c0_19 = arith.constant 0 : index
    %c0_20 = arith.constant 0 : index
    %27 = vector.load %arg3[%c0_18, %c0_19, %c0_20] : memref<1x32x256xf32, #tpu.memory_space<vmem>>, vector<1x32x256xf32>
    %28 = vector.shape_cast %27 : vector<1x32x256xf32> to vector<32x256xf32>
    %29 = arith.truncf %28 : vector<32x256xf32> to vector<32x256xbf16>
    %cst_21 = arith.constant dense<0.000000e+00> : vector<32x256xf32>
    %30 = tpu.matmul %26, %29, %cst_21 {dimension_numbers = #tpu.dot_dimension_numbers<[1], [0], [0], [1], [0, 0, 1, 1], [], []>} : vector<32x32xbf16>, vector<32x256xbf16>, vector<32x256xf32> -> vector<32x256xf32>
    %31 = arith.addf %25, %30 : vector<32x256xf32>
    %32 = vector.extract_strided_slice %0 {offsets = [0, 3], sizes = [32, 1], strides = [1, 1]} : vector<32x6xf32> to vector<32x1xf32>
    %33 = vector.broadcast %32 : vector<32x1xf32> to vector<32x256xf32>
    %34 = arith.mulf %31, %33 : vector<32x256xf32>
    %35 = vector.extract_strided_slice %0 {offsets = [0, 4], sizes = [32, 1], strides = [1, 1]} : vector<32x6xf32> to vector<32x1xf32>
    %36 = vector.broadcast %35 : vector<32x1xf32> to vector<32x256xf32>
    %37 = arith.addf %34, %36 : vector<32x256xf32>
    %cst_22 = arith.constant 0.000000e+00 : f32
    %38 = vector.broadcast %cst_22 : f32 to vector<32x256xf32>
    %39 = arith.cmpf oge, %37, %38 : vector<32x256xf32>
    %40 = vector.extract_strided_slice %0 {offsets = [0, 5], sizes = [32, 1], strides = [1, 1]} : vector<32x6xf32> to vector<32x1xf32>
    %41 = vector.broadcast %40 : vector<32x1xf32> to vector<32x256xf32>
    %42 = arith.mulf %37, %41 : vector<32x256xf32>
    %43 = arith.select %39, %37, %42 : vector<32x256xi1>, vector<32x256xf32>
    %c0_23 = arith.constant 0 : index
    %c0_24 = arith.constant 0 : index
    %c0_25 = arith.constant 0 : index
    %44 = vector.load %arg9[%c0_23, %c0_24, %c0_25] : memref<1x32x256xf32, #tpu.memory_space<vmem>>, vector<1x32x256xf32>
    %45 = vector.shape_cast %44 : vector<1x32x256xf32> to vector<32x256xf32>
    %46 = vector.shape_cast %43 : vector<32x256xf32> to vector<1x32x256xf32>
    tpu.vector_store %arg9[%c0_23, %c0_24, %c0_25], %46 {strides = array<i32>} : memref<1x32x256xf32, #tpu.memory_space<vmem>>, vector<1x32x256xf32>,
    %c256_i32 = arith.constant 256 : i32
    %47 = arith.muli %arg1, %c256_i32 : i32
    %c256_i32_26 = arith.constant 256 : i32
    %48 = arith.subi %c256_i32_26, %47 : i32
    %49 = tpu.iota {dimensions = array<i32: 1>} : vector<1x256xi32>
    %50 = vector.broadcast %48 : i32 to vector<1x256xi32>
    %51 = arith.cmpi slt, %49, %50 : vector<1x256xi32>
    %cst_27 = arith.constant 0.000000e+00 : f32
    %52 = vector.shape_cast %51 : vector<1x256xi1> to vector<1x256xi1>
    %53 = vector.broadcast %52 : vector<1x256xi1> to vector<32x256xi1>
    %54 = vector.broadcast %cst_27 : f32 to vector<32x256xf32>
    %55 = arith.select %53, %19, %54 : vector<32x256xi1>, vector<32x256xf32>
    %cst_28 = arith.constant dense<0.000000e+00> : vector<32xf32>
    %56 = vector.multi_reduction <add>, %55, %cst_28 [1] : vector<32x256xf32> to vector<32xf32>
    %57 = vector.shape_cast %56 : vector<32xf32> to vector<32x1xf32>
    %c0_29 = arith.constant 0 : index
    %c0_30 = arith.constant 0 : index
    %c0_31 = arith.constant 0 : index
    %c0_32 = arith.constant 0 : index
    %58 = vector.load %arg10[%c0_29, %c0_30, %c0_31, %c0_32] : memref<1x1x32x1xf32, #tpu.memory_space<vmem>>, vector<1x1x32x1xf32>
    %59 = vector.shape_cast %58 : vector<1x1x32x1xf32> to vector<32x1xf32>
    %60 = vector.shape_cast %57 : vector<32x1xf32> to vector<1x1x32x1xf32>
    tpu.vector_store %arg10[%c0_29, %c0_30, %c0_31, %c0_32], %60 {strides = array<i32>} : memref<1x1x32x1xf32, #tpu.memory_space<vmem>>, vector<1x1x32x1xf32>,
    %cst_33 = arith.constant 0.000000e+00 : f32
    %61 = vector.shape_cast %51 : vector<1x256xi1> to vector<1x256xi1>
    %62 = vector.broadcast %61 : vector<1x256xi1> to vector<32x256xi1>
    %63 = vector.broadcast %cst_33 : f32 to vector<32x256xf32>
    %64 = arith.select %62, %5, %63 : vector<32x256xi1>, vector<32x256xf32>
    %cst_34 = arith.constant dense<0.000000e+00> : vector<32xf32>
    %65 = vector.multi_reduction <add>, %64, %cst_34 [1] : vector<32x256xf32> to vector<32xf32>
    %66 = vector.shape_cast %65 : vector<32xf32> to vector<32x1xf32>
    %c0_35 = arith.constant 0 : index
    %c0_36 = arith.constant 0 : index
    %c0_37 = arith.constant 0 : index
    %c0_38 = arith.constant 0 : index
    %67 = vector.load %arg11[%c0_35, %c0_36, %c0_37, %c0_38] : memref<1x1x32x1xf32, #tpu.memory_space<vmem>>, vector<1x1x32x1xf32>
    %68 = vector.shape_cast %67 : vector<1x1x32x1xf32> to vector<32x1xf32>
    %69 = vector.shape_cast %66 : vector<32x1xf32> to vector<1x1x32x1xf32>
    tpu.vector_store %arg11[%c0_35, %c0_36, %c0_37, %c0_38], %69 {strides = array<i32>} : memref<1x1x32x1xf32, #tpu.memory_space<vmem>>, vector<1x1x32x1xf32>,
    return
  }
  func.func @transform_0(%arg0: i32, %arg1: i32) -> (i32, i32, i32) {
    %c0_i32 = arith.constant 0 : i32
    %c0_i32_0 = arith.constant 0 : i32
    return %arg0, %c0_i32, %arg1 : i32, i32, i32
  }
  func.func @transform_1(%arg0: i32, %arg1: i32) -> (i32, i32, i32) {
    %c0_i32 = arith.constant 0 : i32
    %c0_i32_0 = arith.constant 0 : i32
    return %arg0, %c0_i32, %arg1 : i32, i32, i32
  }
  func.func @transform_2(%arg0: i32, %arg1: i32) -> (i32, i32) {
    %c0_i32 = arith.constant 0 : i32
    %c0_i32_0 = arith.constant 0 : i32
    %c0_i32_1 = arith.constant 0 : i32
    return %c0_i32, %c0_i32_0 : i32, i32
  }
  func.func @transform_3(%arg0: i32, %arg1: i32) -> (i32, i32) {
    %c0_i32 = arith.constant 0 : i32
    %c0_i32_0 = arith.constant 0 : i32
    %c0_i32_1 = arith.constant 0 : i32
    return %c0_i32, %c0_i32_0 : i32, i32
  }
  func.func @transform_4(%arg0: i32, %arg1: i32) -> (i32, i32) {
    %c0_i32 = arith.constant 0 : i32
    %c0_i32_0 = arith.constant 0 : i32
    %c0_i32_1 = arith.constant 0 : i32
    return %c0_i32, %c0_i32_0 : i32, i32
  }
  func.func @transform_5(%arg0: i32, %arg1: i32) -> (i32, i32) {
    %c0_i32 = arith.constant 0 : i32
    %c0_i32_0 = arith.constant 0 : i32
    %c0_i32_1 = arith.constant 0 : i32
    return %c0_i32, %c0_i32_0 : i32, i32
  }
  func.func @transform_6(%arg0: i32, %arg1: i32) -> (i32, i32, i32) {
    %c0_i32 = arith.constant 0 : i32
    %c0_i32_0 = arith.constant 0 : i32
    return %arg0, %c0_i32, %arg1 : i32, i32, i32
  }
  func.func @transform_7(%arg0: i32, %arg1: i32) -> (i32, i32, i32) {
    %c0_i32 = arith.constant 0 : i32
    %c0_i32_0 = arith.constant 0 : i32
    return %arg0, %c0_i32, %arg1 : i32, i32, i32
  }
  func.func @transform_8(%arg0: i32, %arg1: i32) -> (i32, i32, i32, i32) {
    %c0_i32 = arith.constant 0 : i32
    %c0_i32_0 = arith.constant 0 : i32
    %c0_i32_1 = arith.constant 0 : i32
    return %arg0, %arg1, %c0_i32, %c0_i32_0 : i32, i32, i32, i32
  }
  func.func @transform_9(%arg0: i32, %arg1: i32) -> (i32, i32, i32, i32) {
    %c0_i32 = arith.constant 0 : i32
    %c0_i32_0 = arith.constant 0 : i32
    %c0_i32_1 = arith.constant 0 : i32
    return %arg0, %arg1, %c0_i32, %c0_i32_0 : i32, i32, i32, i32
  }
}

module attributes {stable_mosaic.version = 11 : i64} {
  func.func @_scale_kernel(%arg0: i32, %arg1: i32, %arg2: memref<1x32x256xf32, #tpu.memory_space<vmem>>, %arg3: memref<1x32x1xf32, #tpu.memory_space<vmem>>, %arg4: memref<1x32x256xf32, #tpu.memory_space<vmem>>) attributes {dimension_semantics = [#tpu.dimension_semantics<parallel>, #tpu.dimension_semantics<parallel>], iteration_bounds = array<i64: 2, 1>, scalar_prefetch = 0 : i64, scratch_operands = 0 : i64, tpu.core_type = #tpu.core_type<tc>, window_params = [{transform_indices = @transform_0, window_bounds = array<i64: 1, 32, 256>}, {transform_indices = @transform_1, window_bounds = array<i64: 1, 32, 1>}, {transform_indices = @transform_2, window_bounds = array<i64: 1, 32, 256>}]} {
    %c0 = arith.constant 0 : index
    %c0_0 = arith.constant 0 : index
    %c0_1 = arith.constant 0 : index
    %0 = vector.load %arg2[%c0, %c0_0, %c0_1] : memref<1x32x256xf32, #tpu.memory_space<vmem>>, vector<1x32x256xf32>
    %1 = vector.shape_cast %0 : vector<1x32x256xf32> to vector<32x256xf32>
    %c0_2 = arith.constant 0 : index
    %c0_3 = arith.constant 0 : index
    %c0_4 = arith.constant 0 : index
    %2 = vector.load %arg3[%c0_2, %c0_3, %c0_4] : memref<1x32x1xf32, #tpu.memory_space<vmem>>, vector<1x32x1xf32>
    %3 = vector.shape_cast %2 : vector<1x32x1xf32> to vector<32x1xf32>
    %4 = vector.broadcast %3 : vector<32x1xf32> to vector<32x256xf32>
    %5 = arith.mulf %1, %4 : vector<32x256xf32>
    %c0_5 = arith.constant 0 : index
    %c0_6 = arith.constant 0 : index
    %c0_7 = arith.constant 0 : index
    %6 = vector.load %arg4[%c0_5, %c0_6, %c0_7] : memref<1x32x256xf32, #tpu.memory_space<vmem>>, vector<1x32x256xf32>
    %7 = vector.shape_cast %6 : vector<1x32x256xf32> to vector<32x256xf32>
    %8 = vector.shape_cast %5 : vector<32x256xf32> to vector<1x32x256xf32>
    tpu.vector_store %arg4[%c0_5, %c0_6, %c0_7], %8 {strides = array<i32>} : memref<1x32x256xf32, #tpu.memory_space<vmem>>, vector<1x32x256xf32>,
    return
  }
  func.func @transform_0(%arg0: i32, %arg1: i32) -> (i32, i32, i32) {
    %c0_i32 = arith.constant 0 : i32
    %c0_i32_0 = arith.constant 0 : i32
    return %arg0, %c0_i32, %arg1 : i32, i32, i32
  }
  func.func @transform_1(%arg0: i32, %arg1: i32) -> (i32, i32, i32) {
    %c0_i32 = arith.constant 0 : i32
    %c0_i32_0 = arith.constant 0 : i32
    %c0_i32_1 = arith.constant 0 : i32
    return %arg0, %c0_i32, %c0_i32_0 : i32, i32, i32
  }
  func.func @transform_2(%arg0: i32, %arg1: i32) -> (i32, i32, i32) {
    %c0_i32 = arith.constant 0 : i32
    %c0_i32_0 = arith.constant 0 : i32
    return %arg0, %c0_i32, %arg1 : i32, i32, i32
  }
}

</mosaic_0001>

<bundles_post_ra>
// kernel: merge_attention.3
= control target key start
LH: loop header
LB: loop body
LE: loop exit
PB: predicated region body
PF: predicated region fallthrough
CT: control target
= control target key end

     0   :  { %s433_s9 = smov 0   ;;  %s435_s10 = smov 0   ;;  %s469_s0 = inlined_call_operand.vmem [shape: f32[2,32,256], index: 0, kind: input, shape index: {}]   ;;  %s470_s1 = inlined_call_operand.vmem [shape: f32[2,32,1], index: 1, kind: input, shape index: {}]   ;;  %s471_s2 = inlined_call_operand.vmem [shape: f32[2,32,256], index: 2, kind: output, shape index: {}]  }
   0x1   :  { %s437_s11 = smov 0  }
   0x2 LB: > { %s24_s12 = sadd.s32 1, %s411_s10  ;;  %p354_p0 = scmp.ge.s32.totalorder %s415_s11, 1  ;;  %s415_s11 = sphi %s437_s11, %s12_s11   ;;  %s411_s10 = sphi %s435_s10, %s473_s10   ;;  %s407_s9 = sphi %s433_s9, %s472_s9  }
   0x3   : > { %p26_p1 = scmp.ge.s32.totalorder %s24_s12, 2  ;;  %p143_p2 = scmp.lt.s32.totalorder %s415_s11, 3 }
   0x5   : > { %s475_s12 = smov (%p26_p1, %s24_s12), 0  ;;  %p144_p3 = pnand %p354_p0, %p143_p2 }
   0x6   : > { %p179_p4 = scmp.lt.s32.totalorder (!%p144_p3), %s407_s9, 1  ;;  %v417_v0 = vmov (!%p144_p3), 0  }
   0x7   : > { %147 = sbr.rel (%p144_p3) target bundleno = 154 (0x9a), region = 28  ;;  %392 = vset.pattern.permute.xlu1 (!%p144_p3), %v417_v0  ;;  %391 = vset.pattern.permute.xlu0 (!%p144_p3), %v417_v0 }
   0xe   : > { %s477_s9 = smov (!%p179_p4, %s407_s9), 1 }
   0xf   : > { %s364_s13 = sshll.u32 %s477_s9, 5  ;;  %s363_s17 = sshll.u32 %s477_s9, 6 }
  0x10   : > { %s192_s16 = scalar_lea.vmem %s470_s1, %s364_s13  ;;  %s186_s20 = scalar_lea.vmem %s469_s0, %s363_s17 }
  0x11   : > { %v213_v1 = vld [vmem:[%s192_s16 + $0x10] sm:$0xff]  ;;  %v211_v2 = vld [vmem:[%s192_s16] sm:$0xff]  ;;  %v214_v3 = vld [vmem:[%s192_s16 + $0x18] sm:$0xff]  ;;  %s201_s23 = scalar_lea.vmem %s471_s2, %s363_s17 }
  0x12   : > { %227 = vperm.xlu1 %392, %v213_v1   ;;  %217 = vperm.xlu0 %391, %v211_v2   ;;  %v212_v4 = vld [vmem:[%s192_s16 + $0x8] sm:$0xff]  ;;  %v207_v5 = vld [vmem:[%s186_s20 + $0x20] sm:$0xff]  ;;  %v209_v15 = vld [vmem:[%s186_s20 + $0x30] sm:$0xff] }
  0x13   : > { %v208_v6 = vld [vmem:[%s186_s20 + $0x28] sm:$0xff]  ;;  %v203_v7 = vld [vmem:[%s186_s20] sm:$0xff]  ;;  %v210_v16 = vld [vmem:[%s186_s20 + $0x38] sm:$0xff] }
  0x14   : > { %v204_v8 = vld [vmem:[%s186_s20 + $0x8] sm:$0xff]  ;;  %v205_v17 = vld [vmem:[%s186_s20 + $0x10] sm:$0xff]  ;;  %v206_v18 = vld [vmem:[%s186_s20 + $0x18] sm:$0xff] }
  0x16   : > { %232 = vperm.xlu1 %392, %v214_v3   ;;  %222 = vperm.xlu0 %391, %v212_v4  }
  0x91   : > { %v228_v9 = vpop.permute.xlu1 %227  ;;  %v218_v10 = vpop.permute.xlu0 %217 }
  0x92   : > { %v239_v11 = vmul.f32 %v228_v9, %v207_v5  ;;  %v240_v12 = vmul.f32 %v228_v9, %v208_v6  ;;  %v235_v13 = vmul.f32 %v218_v10, %v203_v7  ;;  %v236_v14 = vmul.f32 %v218_v10, %v204_v8 }
  0x94   : > { %247 = vst [vmem:[%s201_s23 + $0x20] sm:$0xff] %v239_v11  ;;  %248 = vst [vmem:[%s201_s23 + $0x28] sm:$0xff] %v240_v12 }
  0x95   : > { %243 = vst [vmem:[%s201_s23] sm:$0xff] %v235_v13  ;;  %244 = vst [vmem:[%s201_s23 + $0x8] sm:$0xff] %v236_v14  ;;  %v233_v19 = vpop.permute.xlu1 %232  ;;  %v223_v20 = vpop.permute.xlu0 %222 }
  0x96   : > { %v241_v21 = vmul.f32 %v233_v19, %v209_v15  ;;  %v242_v22 = vmul.f32 %v233_v19, %v210_v16  ;;  %v237_v23 = vmul.f32 %v223_v20, %v205_v17  ;;  %v238_v24 = vmul.f32 %v223_v20, %v206_v18 }
  0x98   : > { %249 = vst [vmem:[%s201_s23 + $0x30] sm:$0xff] %v241_v21  ;;  %250 = vst [vmem:[%s201_s23 + $0x38] sm:$0xff] %v242_v22 }
  0x99   : > { %245 = vst [vmem:[%s201_s23 + $0x10] sm:$0xff] %v237_v23  ;;  %246 = vst [vmem:[%s201_s23 + $0x18] sm:$0xff] %v238_v24 }
  0x9a PF: > { %s12_s11 = sadd.s32 1, %s415_s11   ;;  %s472_s9 = smov %s411_s10 }
  0x9b   : > { %p9_p5 = scmp.ge.s32.totalorder %s12_s11, 4   ;;  %s473_s10 = smov %s475_s12 }
  0x9d   :  { %11 = sbr.rel (!%p9_p5) target bundleno = 2 (0x2), region = 61 }

// kernel: merge_attention.2
= control target key start
LH: loop header
LB: loop body
LE: loop exit
PB: predicated region body
PF: predicated region fallthrough
CT: control target
= control target key end

     0   :  { %s1460_s30 = smov 0   ;;  %s1462_s10 = smov 0   ;;  %s1671_s0 = inlined_call_operand.vmem [shape: f32[2,128,256], index: 0, kind: input, shape index: {}]   ;;  %s1672_s1 = inlined_call_operand.vmem [shape: f32[2,32,256], index: 1, kind: input, shape index: {}]   ;;  %s1673_s2 = inlined_call_operand.vmem [shape: bf16[32,128], index: 2, kind: input, shape index: {}]   ;;  %s1674_s3 = inlined_call_operand.vmem [shape: bf16[32,32], index: 3, kind: input, shape index: {}]   ;;  %s1675_s4 = inlined_call_operand.vmem [shape: bf16[32,32], index: 4, kind: input, shape index: {}]   ;;  %s1676_s5 = inlined_call_operand.vmem [shape: f32[32,6], index: 5, kind: input, shape index: {}]   ;;  %s1677_s6 = inlined_call_operand.vmem [shape: f32[2,32,256], index: 6, kind: output, shape index: {0}]   ;;  %s1678_s7 = inlined_call_operand.vmem [shape: f32[2,32,256], index: 7, kind: output, shape index: {1}]   ;;  %s1679_s8 = inlined_call_operand.vmem [shape: f32[2,1,32,1], index: 8, kind: output, shape index: {2}]   ;;  %s1680_s9 = inlined_call_operand.vmem [shape: f32[2,1,32,1], index: 9, kind: output, shape index: {3}]  }
   0x1   :  { %s1464_s11 = smov 0  }
   0x2 LB: > { %s32_s12 = sadd.s32 1, %s1398_s10  ;;  %p1291_p0 = scmp.ge.s32.totalorder %s1402_s11, 1  ;;  %s1402_s11 = sphi %s1464_s11, %s20_s11   ;;  %s1398_s10 = sphi %s1462_s10, %s1682_s10   ;;  %s1394_s30 = sphi %s1460_s30, %s1681_s30  }
   0x3   : > { %p34_p1 = scmp.ge.s32.totalorder %s32_s12, 2  ;;  %p338_p2 = scmp.lt.s32.totalorder %s1402_s11, 3 }
   0x5   : > { %s1684_s12 = smov (%p34_p1, %s32_s12), 0  ;;  %p339_p3 = pnand %p1291_p0, %p338_p2 }
   0x6   : > { %p419_p4 = scmp.lt.s32.totalorder (!%p339_p3), %s1394_s30, 1  ;;  %v1404_v0 = vmov (!%p339_p3), 0   ;;  %v1405_v1 = vmov (!%p339_p3), 1   ;;  %v1485_v2 = vld [vmem:[%s1676_s5] sm:$0xff] (!%p339_p3)  ;;  %v1494_v3 = vld [vmem:[%s1676_s5 + $0x8] sm:$0xff] (!%p339_p3)  ;;  %v1516_v17 = vld [vmem:[%s1676_s5 + $0x18] sm:$0xff] (!%p339_p3) }
   0x7   : > { %342 = sbr.rel (%p339_p3) target bundleno = 519 (0x207), region = 44  ;;  %585 = vmatprep.mubr.bf16.mxu0 (!%p339_p3), %v1404_v0  ;;  %1360 = vset.pattern.permute.xlu0 (!%p339_p3), %v1404_v0  ;;  %v1521_v18 = vld [vmem:[%s1676_s5 + $0x10] sm:$0xff] (!%p339_p3)  ;;  %v1406_v31 = vmov (!%p339_p3), 2   ;;  %v1407_v50 = vmov (!%p339_p3), 3   ;;  %v1374_v56 = vld [vmem:[%s1673_s2] sm:$0xff] (!%p339_p3)   ;;  %v1375_v57 = vld [vmem:[%s1673_s2 + $0x8] sm:$0xff] (!%p339_p3)  }
   0x8   : > { %1361 = vset.pattern.permute.xlu1 (!%p339_p3), %v1405_v1  ;;  %779 = vmatprep.mubr.bf16.mxu1 (!%p339_p3), %v1404_v0  ;;  %vm740_vm0 = vcmask (!%p339_p3), 261120   ;;  %vm997_vm9 = vcmask (!%p339_p3), 7168  }
   0x9   : > { %635 = vperm.xlu1 (!%p339_p3), %1361, %v1485_v2   ;;  %608 = vperm.xlu0 (!%p339_p3), %1360, %v1485_v2  }
   0xd   : > { %639 = vperm.xlu1 (!%p339_p3), %1361, %v1494_v3   ;;  %613 = vperm.xlu0 (!%p339_p3), %1360, %v1494_v3  }
   0xe   : > { %s1686_s30 = smov (!%p419_p4, %s1394_s30), 1 }
   0xf   : > { %s1316_s15 = sshll.u32 %s1686_s30, 8  ;;  %s1566_s29 = sshll.u32 %s1686_s30, 6 }
  0x10   : > { %s1499_s20 = scalar_lea.vmem %s1671_s0, %s1316_s15  ;;  %s436_s15 = scalar_lea.vmem %s1672_s1, %s1566_s29 }
  0x11   : > { %v482_v4 = vld [vmem:[%s1499_s20 + $0x8] sm:$0xff]  ;;  %v484_v5 = vld [vmem:[%s1499_s20 + $0x18] sm:$0xff]  ;;  %v481_v6 = vld [vmem:[%s1499_s20] sm:$0xff]  ;;  %1362 = vset.pattern.permute.xlu1 %v1404_v0  ;;  %618 = vperm.xlu0 %1360, %v1521_v18   ;;  %s1586_s22 = scalar_lea.vmem %s1677_s6, %s1566_s29  ;;  %s1320_s23 = sshll.u32 %s1686_s30, 5 }
  0x12   : > { %v514_v7 = vpack.c.bf16 %v484_v5, %v482_v4  ;;  %v483_v8 = vld [vmem:[%s1499_s20 + $0x10] sm:$0xff]  ;;  %v486_v9 = vld [vmem:[%s1499_s20 + $0x28] sm:$0xff]  ;;  %v488_v10 = vld [vmem:[%s1499_s20 + $0x38] sm:$0xff]  ;;  %623 = vperm.xlu1 %1362, %v1516_v17   ;;  %s475_s26 = scalar_lea.vmem %s1680_s9, %s1320_s23  ;;  %s466_s17 = scalar_lea.vmem %s1679_s8, %s1320_s23 }
  0x13   : > { %v513_v11 = vpack.c.bf16 %v483_v8, %v481_v6  ;;  %v516_v12 = vpack.c.bf16 %v488_v10, %v486_v9  ;;  %v485_v13 = vld [vmem:[%s1499_s20 + $0x20] sm:$0xff]  ;;  %v487_v14 = vld [vmem:[%s1499_s20 + $0x30] sm:$0xff]  ;;  %v490_v15 = vld [vmem:[%s1499_s20 + $0x48] sm:$0xff]  ;;  %s1648_s19 = scalar_lea.vmem %s1678_s7, %s1566_s29 }
  0x14   : > { %553 = vmatprep.subr.bf16.mxu0 %v514_v7  ;;  %v492_v16 = vld [vmem:[%s1499_s20 + $0x58] sm:$0xff]  ;;  %v515_v19 = vpack.c.bf16 %v487_v14, %v485_v13  ;;  %v489_v21 = vld [vmem:[%s1499_s20 + $0x40] sm:$0xff]  ;;  %v491_v22 = vld [vmem:[%s1499_s20 + $0x50] sm:$0xff] }
  0x15   : > { %554 = vmatpush1.bf16.msra.mxu0 %v513_v11  ;;  %v518_v20 = vpack.c.bf16 %v492_v16, %v490_v15  ;;  %v494_v23 = vld [vmem:[%s1499_s20 + $0x68] sm:$0xff]  ;;  %v496_v24 = vld [vmem:[%s1499_s20 + $0x78] sm:$0xff]  ;;  %v517_v25 = vpack.c.bf16 %v491_v22, %v489_v21  ;;  %v493_v27 = vld [vmem:[%s1499_s20 + $0x60] sm:$0xff]  ;;  %1363 = vset.pattern.permute.xlu0 %v1406_v31  ;;  %v1408_v15 = vmov 4  }
  0x16   : > { %555 = vmatprep.subr.bf16.mxu0 %v516_v12  ;;  %v520_v26 = vpack.c.bf16 %v496_v24, %v494_v23  ;;  %v495_v28 = vld [vmem:[%s1499_s20 + $0x70] sm:$0xff]  ;;  %v498_v29 = vld [vmem:[%s1499_s20 + $0x88] sm:$0xff]  ;;  %v500_v30 = vld [vmem:[%s1499_s20 + $0x98] sm:$0xff]  ;;  %1364 = vset.pattern.permute.xlu1 %v1406_v31 }
  0x17   : > { %671 = vperm.xlu1 %1364, %v1494_v3   ;;  %667 = vperm.xlu0 %1363, %v1485_v2   ;;  %v519_v32 = vpack.c.bf16 %v495_v28, %v493_v27  ;;  %v522_v33 = vpack.c.bf16 %v500_v30, %v498_v29  ;;  %v497_v34 = vld [vmem:[%s1499_s20 + $0x80] sm:$0xff]  ;;  %v499_v35 = vld [vmem:[%s1499_s20 + $0x90] sm:$0xff]  ;;  %v502_v36 = vld [vmem:[%s1499_s20 + $0xa8] sm:$0xff] }
  0x18   : > { %v504_v37 = vld [vmem:[%s1499_s20 + $0xb8] sm:$0xff]  ;;  %v521_v38 = vpack.c.bf16 %v499_v35, %v497_v34  ;;  %v501_v40 = vld [vmem:[%s1499_s20 + $0xa0] sm:$0xff]  ;;  %v503_v41 = vld [vmem:[%s1499_s20 + $0xb0] sm:$0xff] }
  0x19   : > { %556 = vmatpush1.bf16.msra.mxu0 %v515_v19  ;;  %v524_v39 = vpack.c.bf16 %v504_v37, %v502_v36  ;;  %v506_v42 = vld [vmem:[%s1499_s20 + $0xc8] sm:$0xff]  ;;  %v508_v43 = vld [vmem:[%s1499_s20 + $0xd8] sm:$0xff]  ;;  %v523_v44 = vpack.c.bf16 %v503_v41, %v501_v40  ;;  %v505_v46 = vld [vmem:[%s1499_s20 + $0xc0] sm:$0xff] }
  0x1a   : > { %557 = vmatprep.subr.bf16.mxu0 %v518_v20  ;;  %v526_v45 = vpack.c.bf16 %v508_v43, %v506_v42  ;;  %v507_v47 = vld [vmem:[%s1499_s20 + $0xd0] sm:$0xff]  ;;  %v510_v48 = vld [vmem:[%s1499_s20 + $0xe8] sm:$0xff]  ;;  %v512_v49 = vld [vmem:[%s1499_s20 + $0xf8] sm:$0xff] }
  0x1b   : > { %1365 = vset.pattern.permute.xlu1 %v1405_v1  ;;  %1366 = vset.pattern.permute.xlu0 %v1405_v1  ;;  %v525_v51 = vpack.c.bf16 %v507_v47, %v505_v46  ;;  %v528_v52 = vpack.c.bf16 %v512_v49, %v510_v48  ;;  %v509_v53 = vld [vmem:[%s1499_s20 + $0xe0] sm:$0xff]  ;;  %v511_v54 = vld [vmem:[%s1499_s20 + $0xf0] sm:$0xff]  ;;  %v719_v58 = vld [vmem:[%s436_s15 + $0x8] sm:$0xff] }
  0x1c   : > { %643 = vperm.xlu1 %1365, %v1521_v18   ;;  %647 = vperm.xlu0 %1366, %v1516_v17   ;;  %v527_v55 = vpack.c.bf16 %v511_v54, %v509_v53  ;;  %v721_v59 = vld [vmem:[%s436_s15 + $0x18] sm:$0xff]  ;;  %v718_v61 = vld [vmem:[%s436_s15] sm:$0xff]  ;;  %v720_v62 = vld [vmem:[%s436_s15 + $0x10] sm:$0xff] }
  0x1d   : > { %558 = vmatpush1.bf16.msra.mxu0 %v517_v25  ;;  %v727_v60 = vpack.c.bf16 %v721_v59, %v719_v58  ;;  %v726_v63 = vpack.c.bf16 %v720_v62, %v718_v61  ;;  %v1013_v1 = vadd.f32 %v721_v59, %v720_v62  ;;  %v723_v4 = vld [vmem:[%s436_s15 + $0x28] sm:$0xff]  ;;  %v725_v5 = vld [vmem:[%s436_s15 + $0x38] sm:$0xff]  ;;  %v1010_v7 = vadd.f32 %v719_v58, %v718_v61  ;;  %v722_v8 = vld [vmem:[%s436_s15 + $0x20] sm:$0xff] }
  0x1e   : > { %559 = vmatprep.subr.bf16.mxu0 %v520_v26  ;;  %v729_v6 = vpack.c.bf16 %v725_v5, %v723_v4  ;;  %v724_v9 = vld [vmem:[%s436_s15 + $0x30] sm:$0xff]  ;;  %v1376_v12 = vld [vmem:[%s1675_s4] sm:$0xff]   ;;  %v1016_v13 = vadd.f32 %v723_v4, %v722_v8  ;;  %v1377_v14 = vld [vmem:[%s1675_s4 + $0x8] sm:$0xff]  }
  0x1f   : > { %747 = vmatprep.subr.bf16.mxu1 %v727_v60  ;;  %v728_v10 = vpack.c.bf16 %v724_v9, %v722_v8  ;;  %v1019_v11 = vadd.f32 %v725_v5, %v724_v9 }
  0x20   : > { %1367 = vset.pattern.permute.xlu1 %v1406_v31  ;;  %1368 = vset.pattern.permute.xlu0 %v1407_v50 }
  0x21   : > { %560 = vmatpush1.bf16.msra.mxu0 %v519_v32  ;;  %675 = vperm.xlu1 %1367, %v1521_v18  }
  0x22   : > { %561 = vmatprep.subr.bf16.mxu0 %v522_v33  ;;  %870 = vperm.xlu0 %1368, %v1485_v2  }
  0x23   : > { %748 = vmatpush1.bf16.msra.mxu1 %v726_v63 }
  0x24   : > { %749 = vmatprep.subr.bf16.mxu1 %v729_v6 }
  0x25   : > { %562 = vmatpush1.bf16.msra.mxu0 %v521_v38  ;;  %679 = vperm.xlu1 %1367, %v1516_v17  }
  0x26   : > { %563 = vmatprep.subr.bf16.mxu0 %v524_v39  ;;  %882 = vperm.xlu0 %1368, %v1516_v17  }
  0x27   : > { %750 = vmatpush1.bf16.msra.mxu1 %v728_v10 }
  0x29   : > { %564 = vmatpush1.bf16.msra.mxu0 %v523_v44  ;;  %1369 = vset.pattern.permute.xlu1 %v1407_v50 }
  0x2a   : > { %565 = vmatprep.subr.bf16.mxu0 %v526_v45  ;;  %874 = vperm.xlu1 %1369, %v1494_v3  }
  0x2b   : > { %1308 = vmatmul.mubr.msk.bf16.vlgmr.msra.gmra.mrb[0].mxu1 %vm740_vm0, %v1376_v12  ;;  %1370 = vset.pattern.permute.xlu0 %v1408_v15 }
  0x2c   : > { %789 = vmatprep.mubr.bf16.mxu1 %v1404_v0 }
  0x2d   : > { %566 = vmatpush1.bf16.msra.mxu0 %v525_v51 }
  0x2e   : > { %567 = vmatprep.subr.bf16.mxu0 %v528_v52  ;;  %878 = vperm.xlu1 %1369, %v1521_v18  }
  0x31   : > { %568 = vmatpush1.bf16.msra.mxu0 %v527_v55 }
  0x32   : > { %1371 = vset.pattern.permute.xlu1 %v1408_v15 }
  0x33   : > { %1309 = vmatmul.mubr.msk.bf16.gmra.mrb[4].mxu1 %vm740_vm0, %v1377_v14 }
  0x34   : > { %586 = vmatmul.mubr.bf16.vlgmr.msra.gmra.mrb[0].mxu0 %v1374_v56  ;;  %848 = vmatprep.mubr.bf16.mxu1 %v1404_v0 }
  0x35   : > { %595 = vmatprep.mubr.bf16.mxu0 %v1404_v0 }
  0x3c   : > { %596 = vmatmul.mubr.bf16.gmra.mrb[4].mxu0 %v1375_v57 }
  0x45   : > { %1011 = vadd.xlane.f32.xlu0 %v1010_v7 }
  0x49   : > { %1017 = vadd.xlane.f32.xlu0 %v1016_v13 }
  0x52   : > { %1014 = vadd.xlane.f32.xlu1 %v1013_v1 }
  0x56   : > { %1020 = vadd.xlane.f32.xlu1 %v1019_v11 }
  0x88   : > { %v636_v16 = vpop.permute.xlu1 %635  ;;  %v609_v21 = vpop.permute.xlu0 %608 }
  0x8c   : > { %v640_v19 = vpop.permute.xlu1 %639  ;;  %v614_v23 = vpop.permute.xlu0 %613 }
  0x90   : > { %v619_v25 = vpop.permute.xlu0 %618 }
  0x91   : > { %v624_v20 = vpop.permute.xlu1 %623 }
  0x96   : > { %v672_v22 = vpop.permute.xlu1 %671  ;;  %v668_v27 = vpop.permute.xlu0 %667 }
  0x9b   : > { %v644_v24 = vpop.permute.xlu1 %643  ;;  %v648_v31 = vpop.permute.xlu0 %647 }
  0xa0   : > { %v676_v26 = vpop.permute.xlu1 %675 }
  0xa1   : > { %v1590_v45 = vpop.permute.xlu0 %870 }
  0xa4   : > { %v680_v34 = vpop.permute.xlu1 %679 }
  0xa5   : > { %v1598_v6 = vpop.permute.xlu0 %882 }
  0xa9   : > { %v1588_v44 = vpop.permute.xlu1 %874 }
  0xad   : > { %v1596_v5 = vpop.permute.xlu1 %878 }
  0xdf   : > { %v1015_v15 = vpop.xlane.xlu1 %1014 }
  0xe0   : > { %1023 = vst.msk [vmem:[%s475_s26 + $0x8] sm:$0xff] %vm997_vm9, %v1015_v15 }
 0x107   : > { %v587_v28 = vpop.f32.mrb[0].mxu0 }
 0x108   : > { %v626_v29 = vmul.f32 %v609_v21, %v587_v28  ;;  %v589_v30 = vpop.f32.mrb[1].mxu0  ;;  %v1379_v28 = vld [vmem:[%s1674_s3 + $0x8] sm:$0xff]  }
 0x109   : > { %v627_v32 = vmul.f32 %v609_v21, %v589_v30  ;;  %v591_v33 = vpop.f32.mrb[2].mxu0 }
 0x10a   : > { %v650_v35 = vadd.f32 %v636_v16, %v626_v29  ;;  %v628_v36 = vmul.f32 %v614_v23, %v591_v33  ;;  %v593_v37 = vpop.f32.mrb[3].mxu0  ;;  %v1409_v29 = vmov 5  }
 0x10b   : > { %v651_v38 = vadd.f32 %v636_v16, %v627_v32  ;;  %v629_v39 = vmul.f32 %v614_v23, %v593_v37 }
 0x10c   : > { %v652_v40 = vadd.f32 %v640_v19, %v628_v36  ;;  %v682_v41 = vmul.f32 %v668_v27, %v650_v35  ;;  %vm658_vm1 = vcmp.ge.f32.partialorder %v650_v35, 0.0 }
 0x10d   : > { %v653_v42 = vadd.f32 %v640_v19, %v629_v39  ;;  %v683_v43 = vmul.f32 %v668_v27, %v651_v38  ;;  %vm659_vm2 = vcmp.ge.f32.partialorder %v651_v38, 0.0 }
 0x10e   : > { %v684_v46 = vmul.f32 %v672_v22, %v652_v40  ;;  %v690_v47 = vsel %vm658_vm1, %v650_v35, %v682_v41  ;;  %vm660_vm3 = vcmp.ge.f32.partialorder %v652_v40, 0.0 }
 0x10f   : > { %v685_v48 = vmul.f32 %v672_v22, %v653_v42  ;;  %v597_v49 = vpop.f32.mrb[4].mxu0  ;;  %v691_v50 = vsel %vm659_vm2, %v651_v38, %v683_v43  ;;  %698 = vst [vmem:[%s1586_s22] sm:$0xff] %v690_v47  ;;  %vm661_vm4 = vcmp.ge.f32.partialorder %v653_v42, 0.0  ;;  %v1012_v22 = vpop.xlane.xlu0 %1011 }
 0x110   : > { %v630_v51 = vmul.f32 %v619_v25, %v597_v49  ;;  %v599_v52 = vpop.f32.mrb[5].mxu0  ;;  %v985_v53 = vadd.f32 %v691_v50, %v690_v47  ;;  %699 = vst [vmem:[%s1586_s22 + $0x8] sm:$0xff] %v691_v50  ;;  %v692_v54 = vsel %vm660_vm3, %v652_v40, %v684_v46  ;;  %1022 = vst.msk [vmem:[%s475_s26] sm:$0xff] %vm997_vm9, %v1012_v22 }
 0x111   : > { %v631_v55 = vmul.f32 %v619_v25, %v599_v52  ;;  %v601_v56 = vpop.f32.mrb[6].mxu0  ;;  %v693_v57 = vsel %vm661_vm4, %v653_v42, %v685_v48  ;;  %700 = vst [vmem:[%s1586_s22 + $0x10] sm:$0xff] %v692_v54  ;;  %v710_v58 = vpack.c.bf16 %v692_v54, %v690_v47  ;;  %v1021_v25 = vpop.xlane.xlu1 %1020 }
 0x112   : > { %v654_v59 = vadd.f32 %v644_v24, %v630_v51  ;;  %v632_v60 = vmul.f32 %v624_v20, %v601_v56  ;;  %986 = vadd.xlane.f32.xlu1 %v985_v53  ;;  %v603_v61 = vpop.f32.mrb[7].mxu0  ;;  %v988_v62 = vadd.f32 %v693_v57, %v692_v54  ;;  %701 = vst [vmem:[%s1586_s22 + $0x18] sm:$0xff] %v693_v57  ;;  %1025 = vst.msk [vmem:[%s475_s26 + $0x18] sm:$0xff] %vm997_vm9, %v1021_v25 }
 0x113   : > { %v711_v63 = vpack.c.bf16 %v693_v57, %v691_v50  ;;  %v655_v1 = vadd.f32 %v644_v24, %v631_v55  ;;  %v633_v4 = vmul.f32 %v624_v20, %v603_v61  ;;  %v1018_v27 = vpop.xlane.xlu0 %1017 }
 0x114   : > { %v686_v7 = vmul.f32 %v676_v26, %v654_v59  ;;  %v656_v8 = vadd.f32 %v648_v31, %v632_v60  ;;  %989 = vadd.xlane.f32.xlu0 %v988_v62  ;;  %vm662_vm5 = vcmp.ge.f32.partialorder %v654_v59, 0.0  ;;  %1024 = vst.msk [vmem:[%s475_s26 + $0x10] sm:$0xff] %vm997_vm9, %v1018_v27 }
 0x115   : > { %816 = vmatprep.subr.bf16.mxu1 %v711_v63  ;;  %v687_v9 = vmul.f32 %v676_v26, %v655_v1  ;;  %v657_v10 = vadd.f32 %v648_v31, %v633_v4  ;;  %vm663_vm6 = vcmp.ge.f32.partialorder %v655_v1, 0.0  ;;  %v1378_v26 = vld [vmem:[%s1674_s3] sm:$0xff]  }
 0x116   : > { %817 = vmatpush1.bf16.msra.mxu1 %v710_v58  ;;  %vm664_vm7 = vcmp.ge.f32.partialorder %v656_v8, 0.0  ;;  %v688_v11 = vmul.f32 %v680_v34, %v656_v8  ;;  %v694_v12 = vsel %vm662_vm5, %v654_v59, %v686_v7 }
 0x117   : > { %vm665_vm8 = vcmp.ge.f32.partialorder %v657_v10, 0.0  ;;  %v689_v13 = vmul.f32 %v680_v34, %v657_v10  ;;  %v695_v14 = vsel %vm663_vm6, %v655_v1, %v687_v9  ;;  %702 = vst [vmem:[%s1586_s22 + $0x20] sm:$0xff] %v694_v12 }
 0x118   : > { %v696_v16 = vsel %vm664_vm7, %v656_v8, %v688_v11  ;;  %v991_v19 = vadd.f32 %v695_v14, %v694_v12  ;;  %703 = vst [vmem:[%s1586_s22 + $0x28] sm:$0xff] %v695_v14 }
 0x119   : > { %704 = vst [vmem:[%s1586_s22 + $0x30] sm:$0xff] %v696_v16  ;;  %v712_v20 = vpack.c.bf16 %v696_v16, %v694_v12  ;;  %v697_v21 = vsel %vm665_vm8, %v657_v10, %v689_v13 }
 0x11a   : > { %992 = vadd.xlane.f32.xlu0 %v991_v19  ;;  %705 = vst [vmem:[%s1586_s22 + $0x38] sm:$0xff] %v697_v21  ;;  %v713_v23 = vpack.c.bf16 %v697_v21, %v695_v14  ;;  %v994_v24 = vadd.f32 %v697_v21, %v696_v16 }
 0x11c   : > { %818 = vmatprep.subr.bf16.mxu1 %v713_v23 }
 0x11d   : > { %819 = vmatpush1.bf16.msra.mxu1 %v712_v20 }
 0x120   : > { %1312 = vmatmul.mubr.msk.bf16.vlgmr.msra.gmra.mrb[0].mxu1 %vm740_vm0, %v1378_v26 }
 0x121   : > { %858 = vmatprep.mubr.bf16.mxu1 %v1404_v0 }
 0x123   : > { %898 = vperm.xlu1 %1371, %v1494_v3  }
 0x127   : > { %902 = vperm.xlu1 %1371, %v1521_v18  }
 0x128   : > { %1313 = vmatmul.mubr.msk.bf16.gmra.mrb[4].mxu1 %vm740_vm0, %v1379_v28 }
 0x12b   : > { %906 = vperm.xlu1 %1371, %v1516_v17  }
 0x12f   : > { %1372 = vset.pattern.permute.xlu1 %v1409_v29 }
 0x130   : > { %926 = vperm.xlu1 %1372, %v1485_v2   ;;  %894 = vperm.xlu0 %1370, %v1485_v2  }
 0x134   : > { %930 = vperm.xlu1 %1372, %v1494_v3   ;;  %1373 = vset.pattern.permute.xlu0 %v1409_v29 }
 0x138   : > { %934 = vperm.xlu1 %1372, %v1521_v18  }
 0x15c   : > { %995 = vadd.xlane.f32.xlu1 %v994_v24 }
 0x16d   : > { %938 = vperm.xlu1 %1372, %v1516_v17  }
 0x19f   : > { %v987_v0 = vpop.xlane.xlu1 %986 }
 0x1a0   : > { %998 = vst.msk [vmem:[%s466_s17] sm:$0xff] %vm997_vm9, %v987_v0 }
 0x1a1   : > { %v990_v30 = vpop.xlane.xlu0 %989 }
 0x1a2   : > { %999 = vst.msk [vmem:[%s466_s17 + $0x8] sm:$0xff] %vm997_vm9, %v990_v30 }
 0x1a3   : > { %v899_v3 = vpop.permute.xlu1 %898 }
 0x1a7   : > { %v993_v2 = vpop.xlane.xlu0 %992  ;;  %v903_v31 = vpop.permute.xlu1 %902 }
 0x1a8   : > { %1000 = vst.msk [vmem:[%s466_s17 + $0x10] sm:$0xff] %vm997_vm9, %v993_v2 }
 0x1ab   : > { %v907_v18 = vpop.permute.xlu1 %906 }
 0x1af   : > { %v927_v32 = vpop.permute.xlu1 %926  ;;  %v895_v36 = vpop.permute.xlu0 %894 }
 0x1b3   : > { %v931_v17 = vpop.permute.xlu1 %930 }
 0x1b7   : > { %v935_v33 = vpop.permute.xlu1 %934 }
 0x1e9   : > { %v996_v34 = vpop.xlane.xlu1 %995 }
 0x1ea   : > { %1001 = vst.msk [vmem:[%s466_s17 + $0x18] sm:$0xff] %vm997_vm9, %v996_v34 }
 0x1ed   : > { %v939_v9 = vpop.permute.xlu1 %938 }
 0x1f3   : > { %v850_v35 = vpop.f32.mrb[0].mxu1 }
 0x1f4   : > { %v885_v37 = vmul.f32 %v1590_v45, %v850_v35  ;;  %v852_v38 = vpop.f32.mrb[1].mxu1 }
 0x1f5   : > { %v886_v39 = vmul.f32 %v1590_v45, %v852_v38  ;;  %v854_v40 = vpop.f32.mrb[2].mxu1 }
 0x1f6   : > { %v909_v41 = vadd.f32 %v895_v36, %v885_v37  ;;  %v887_v42 = vmul.f32 %v1588_v44, %v854_v40  ;;  %v856_v43 = vpop.f32.mrb[3].mxu1 }
 0x1f7   : > { %v910_v46 = vadd.f32 %v895_v36, %v886_v39  ;;  %v888_v47 = vmul.f32 %v1588_v44, %v856_v43 }
 0x1f8   : > { %vm917_vm10 = vcmp.ge.f32.partialorder %v909_v41, 0.0  ;;  %v941_v48 = vmul.f32 %v927_v32, %v909_v41  ;;  %v911_v49 = vadd.f32 %v899_v3, %v887_v42 }
 0x1f9   : > { %vm918_vm11 = vcmp.ge.f32.partialorder %v910_v46, 0.0  ;;  %v942_v45 = vmul.f32 %v927_v32, %v910_v46  ;;  %v912_v50 = vadd.f32 %v899_v3, %v888_v47 }
 0x1fa   : > { %v949_v51 = vsel %vm917_vm10, %v909_v41, %v941_v48  ;;  %vm919_vm12 = vcmp.ge.f32.partialorder %v911_v49, 0.0  ;;  %v943_v52 = vmul.f32 %v931_v17, %v911_v49 }
 0x1fb   : > { %v950_v53 = vsel %vm918_vm11, %v910_v46, %v942_v45  ;;  %957 = vst [vmem:[%s1648_s19] sm:$0xff] %v949_v51  ;;  %vm920_vm13 = vcmp.ge.f32.partialorder %v912_v50, 0.0  ;;  %v944_v44 = vmul.f32 %v931_v17, %v912_v50  ;;  %v860_v54 = vpop.f32.mrb[4].mxu1 }
 0x1fc   : > { %958 = vst [vmem:[%s1648_s19 + $0x8] sm:$0xff] %v950_v53  ;;  %v951_v55 = vsel %vm919_vm12, %v911_v49, %v943_v52  ;;  %v889_v56 = vmul.f32 %v1596_v5, %v860_v54  ;;  %v862_v57 = vpop.f32.mrb[5].mxu1 }
 0x1fd   : > { %959 = vst [vmem:[%s1648_s19 + $0x10] sm:$0xff] %v951_v55  ;;  %v952_v58 = vsel %vm920_vm13, %v912_v50, %v944_v44  ;;  %v890_v59 = vmul.f32 %v1596_v5, %v862_v57  ;;  %v864_v60 = vpop.f32.mrb[6].mxu1 }
 0x1fe   : > { %960 = vst [vmem:[%s1648_s19 + $0x18] sm:$0xff] %v952_v58  ;;  %v913_v61 = vadd.f32 %v903_v31, %v889_v56  ;;  %v891_v62 = vmul.f32 %v1598_v6, %v864_v60  ;;  %v866_v63 = vpop.f32.mrb[7].mxu1 }
 0x1ff   : > { %v914_v1 = vadd.f32 %v903_v31, %v890_v59  ;;  %v892_v4 = vmul.f32 %v1598_v6, %v866_v63 }
 0x200   : > { %vm921_vm14 = vcmp.ge.f32.partialorder %v913_v61, 0.0  ;;  %v945_v7 = vmul.f32 %v935_v33, %v913_v61  ;;  %v915_v8 = vadd.f32 %v907_v18, %v891_v62 }
 0x201   : > { %vm922_vm15 = vcmp.ge.f32.partialorder %v914_v1, 0.0  ;;  %v946_v10 = vmul.f32 %v935_v33, %v914_v1  ;;  %v916_v5 = vadd.f32 %v907_v18, %v892_v4 }
 0x202   : > { %v953_v11 = vsel %vm921_vm14, %v913_v61, %v945_v7  ;;  %vm923_vm0 = vcmp.ge.f32.partialorder %v915_v8, 0.0  ;;  %v947_v12 = vmul.f32 %v939_v9, %v915_v8 }
 0x203   : > { %961 = vst [vmem:[%s1648_s19 + $0x20] sm:$0xff] %v953_v11  ;;  %v954_v13 = vsel %vm922_vm15, %v914_v1, %v946_v10  ;;  %vm924_vm1 = vcmp.ge.f32.partialorder %v916_v5, 0.0  ;;  %v948_v14 = vmul.f32 %v939_v9, %v916_v5 }
 0x204   : > { %962 = vst [vmem:[%s1648_s19 + $0x28] sm:$0xff] %v954_v13  ;;  %v955_v15 = vsel %vm923_vm0, %v915_v8, %v947_v12 }
 0x205   : > { %963 = vst [vmem:[%s1648_s19 + $0x30] sm:$0xff] %v955_v15  ;;  %v956_v6 = vsel %vm924_vm1, %v916_v5, %v948_v14 }
 0x206   : > { %964 = vst [vmem:[%s1648_s19 + $0x38] sm:$0xff] %v956_v6 }
 0x207 PF: > { %s20_s11 = sadd.s32 1, %s1402_s11   ;;  %s1681_s30 = smov %s1398_s10 }
 0x208   : > { %p17_p5 = scmp.ge.s32.totalorder %s20_s11, 4   ;;  %s1682_s10 = smov %s1684_s12 }
 0x20a   :  { %19 = sbr.rel (!%p17_p5) target bundleno = 2 (0x2), region = 113 }

</bundles_post_ra>
